<compile_context>
chip_gen: v6e
topology: v6e:2x2x1
jax: 0.10.0
libtpu: 0.0.40
codegen_flags: <defaults>
</compile_context>

<pallas_src>
import functools
from typing import NamedTuple

import jax
import jax.numpy as jnp
from jax import lax
from jax.experimental import pallas as pl
from jax.experimental.pallas import tpu as pltpu

_LANE = 128
_ROW_ALIGN = 16  # row tiles rounded to 16 so bf16 (16,128) sublane packing is clean


def _round_up(v, m):
    return ((v + m - 1) // m) * m


def _tpu_vmem_capacity_bytes():
    try:
        info = pltpu.get_tpu_info()
        return int(getattr(info, "vmem_capacity_bytes", 128 << 20))
    except Exception:
        return 128 << 20


# ---------------------------------------------------------------------------
# Kernels
# ---------------------------------------------------------------------------
def _ffn_kernel(x_ref, w1_ref, b1_ref, w2_ref, b2_ref, o_ref):
    """Monolithic path: full (tm, H) f32 hidden tile (small / medium H)."""
    x = x_ref[...].astype(jnp.bfloat16)                       # no-op if already bf16
    h = jnp.dot(x, w1_ref[...], preferred_element_type=jnp.float32) + b1_ref[...]
    h = jax.nn.gelu(h, approximate=True)                      # f32 tanh GELU (EUP)
    y = (jnp.dot(h.astype(jnp.bfloat16), w2_ref[...],
                 preferred_element_type=jnp.float32) + b2_ref[...])
    o_ref[...] = y.astype(o_ref.dtype)


def _ffn_kernel_hchunk(x_ref, w1_ref, b1_ref, w2_ref, b2_ref, o_ref, acc_ref,
                       *, h_chunk, n_chunks):
    """Large-H path: chunk the hidden dim so the live f32 intermediate is
    bounded to (tm, h_chunk) plus the (tm, C_pad) accumulator (v7x VMEM)."""
    x = x_ref[...].astype(jnp.bfloat16)
    acc_ref[...] = jnp.zeros_like(acc_ref)

    def body(c, carry):
        hk = pl.multiple_of(c * h_chunk, h_chunk)
        h = jnp.dot(x, w1_ref[:, pl.ds(hk, h_chunk)],
                    preferred_element_type=jnp.float32)
        h = h + b1_ref[:, pl.ds(hk, h_chunk)]
        h = jax.nn.gelu(h, approximate=True)
        acc_ref[...] += jnp.dot(h.astype(jnp.bfloat16),
                                w2_ref[pl.ds(hk, h_chunk), :],
                                preferred_element_type=jnp.float32)
        return carry

    lax.fori_loop(0, n_chunks, body, 0)
    o_ref[...] = (acc_ref[...] + b2_ref[...]).astype(o_ref.dtype)


# ---------------------------------------------------------------------------
# Parameter prep (one-time, hoisted off the hot path)
# ---------------------------------------------------------------------------
class FFNParams(NamedTuple):
    w1: jax.Array  # (C_in_pad, H)   bf16, rows zero-padded to a lane multiple
    b1: jax.Array  # (1, H)          f32
    w2: jax.Array  # (H, C_out_pad)  bf16, cols zero-padded to a lane multiple
    b2: jax.Array  # (1, C_out_pad)  f32


def prepare_ffn_params(w1, b1, w2, b2):
    """One-time weight cast/pad (call at init, NOT per forward)."""
    C, H = w1.shape
    assert w2.shape == (H, C) and b1.shape == (H,) and b2.shape == (C,)
    c_pad = _round_up(C, _LANE)
    w1_p = jnp.pad(w1, ((0, c_pad - C), (0, 0))).astype(jnp.bfloat16)
    w2_p = jnp.pad(w2, ((0, 0), (0, c_pad - C))).astype(jnp.bfloat16)
    b1_p = b1.reshape(1, H).astype(jnp.float32)
    b2_p = jnp.pad(b2, (0, c_pad - C)).reshape(1, c_pad).astype(jnp.float32)
    return FFNParams(w1=w1_p, b1=b1_p, w2=w2_p, b2=b2_p)


# ---------------------------------------------------------------------------
# Forward
# ---------------------------------------------------------------------------
@functools.partial(jax.jit, static_argnames=("tm", "h_chunk"))
def feed_forward(x, params, *, tm=512, h_chunk=2048):
    """x: (B, T, C); params: FFNParams.  Returns (B, T, C) in x.dtype.

    Pass bf16 activations to also halve the x-read / out-write HBM bytes
    (the kernel is HBM-bound for typical FFN hidden sizes).
    """
    B, T, C = x.shape
    Cin_p, H = params.w1.shape
    Cout_p = params.w2.shape[1]
    M = B * T
    out_dtype = x.dtype

    # Row tiling: cap at ~M/2 so the "parallel" axis has >= 2 steps (v7x 2 TCs).
    tm_eff = max(_ROW_ALIGN, min(tm, _round_up(pl.cdiv(M, 2), _ROW_ALIGN)))
    grid_m = pl.cdiv(M, tm_eff)   # ragged tail handled by Pallas; no x row pad

    # x slab: reshape is free; pad lanes only when C is not already lane-dense
    # (real models have C % 128 == 0, so this pass only fires for tiny demos).
    x2 = x.reshape(M, C)
    if Cin_p != C:
        x2 = jnp.pad(x2.astype(jnp.bfloat16), ((0, 0), (0, Cin_p - C)))

    # Kernel selection: chunk H when the (tm, H) f32 tile would blow VMEM.
    use_chunked = (H > h_chunk) and (H % h_chunk == 0)
    if use_chunked:
        kernel = functools.partial(_ffn_kernel_hchunk,
                                   h_chunk=h_chunk, n_chunks=H // h_chunk)
        scratch = [pltpu.VMEM((tm_eff, Cout_p), jnp.float32)]
        h_live = h_chunk
    else:
        kernel = _ffn_kernel
        scratch = []
        h_live = H

    # Generation-aware VMEM budget (single-buffered weights, 2x streamed tiles).
    xb = x2.dtype.itemsize
    ob = jnp.dtype(out_dtype).itemsize
    est = (2 * tm_eff * Cin_p * xb
           + 2 * tm_eff * Cout_p * ob
           + (Cin_p * H + H * Cout_p) * 2
           + (H + Cout_p) * 4
           + tm_eff * h_live * 4
           + (tm_eff * Cout_p * 4 if use_chunked else 0))
    est = int(1.4 * est) + (4 << 20)
    vmem_cap = _tpu_vmem_capacity_bytes() - (16 << 20)   # headroom for compiler scratch
    vmem_limit = int(max(32 << 20, min(est, vmem_cap)))

    cost = pl.CostEstimate(
        flops=2 * M * Cin_p * H + 2 * M * H * Cout_p,
        transcendentals=M * H,
        bytes_accessed=(M * Cin_p * xb + M * Cout_p * ob
                        + (Cin_p * H + H * Cout_p) * 2 + (H + Cout_p) * 4),
    )

    resident = dict(pipeline_mode=pl.Buffered(1))   # constant index_map operands

    out2 = pl.pallas_call(
        kernel,
        out_shape=jax.ShapeDtypeStruct((M, Cout_p), out_dtype),
        grid_spec=pltpu.PrefetchScalarGridSpec(
            num_scalar_prefetch=0,
            grid=(grid_m,),
            in_specs=[
                pl.BlockSpec((tm_eff, Cin_p), lambda i: (i, 0)),          # x (streamed)
                pl.BlockSpec((Cin_p, H), lambda i: (0, 0), **resident),   # W1 (resident)
                pl.BlockSpec((1, H), lambda i: (0, 0), **resident),       # b1
                pl.BlockSpec((H, Cout_p), lambda i: (0, 0), **resident),  # W2 (resident)
                pl.BlockSpec((1, Cout_p), lambda i: (0, 0), **resident),  # b2
            ],
            out_specs=pl.BlockSpec((tm_eff, Cout_p), lambda i: (i, 0)),
            scratch_shapes=scratch,
        ),
        compiler_params=pltpu.CompilerParams(
            dimension_semantics=("parallel",),
            vmem_limit_bytes=vmem_limit,
        ),
        cost_estimate=cost,
    )(x2, params.w1, params.b1, params.w2, params.b2)

    return out2[:, :C].reshape(B, T, C)


def _reference(x, w1, b1, w2, b2):
    # f32 reference with the same tanh-approximate GELU (kernel math, full
    # precision).  torch.nn.GELU()'s erf form differs by <~1e-3 absolute.
    h = jnp.dot(x, w1) + b1
    h = jax.nn.gelu(h, approximate=True)
    return jnp.dot(h, w2) + b2


if __name__ == "__main__":
    # config: n_embd=32, dropout=0.0 (identity at inference); B=2, T=64
    n_embd = 32
    hidden = 4 * n_embd
    B, T = 2, 64

    key = jax.random.PRNGKey(0)
    k_x, k_w1, k_b1, k_w2, k_b2 = jax.random.split(key, 5)

    x = jax.random.normal(k_x, (B, T, n_embd), dtype=jnp.float32)
    # Deterministic synthetic params (nn.Linear weights stored (in, out)).
    w1 = jax.random.normal(k_w1, (n_embd, hidden), dtype=jnp.float32) * 0.02
    b1 = jax.random.normal(k_b1, (hidden,), dtype=jnp.float32) * 0.02
    w2 = jax.random.normal(k_w2, (hidden, n_embd), dtype=jnp.float32) * 0.02
    b2 = jax.random.normal(k_b2, (n_embd,), dtype=jnp.float32) * 0.02

    # One-time weight prep, off the per-call hot path.
    params = prepare_ffn_params(w1, b1, w2, b2)

    # f32 activations (module-faithful).
    out = jax.block_until_ready(feed_forward(x, params))
    ref = _reference(x, w1, b1, w2, b2)
    assert out.shape == (B, T, n_embd)
    assert out.dtype == x.dtype
    assert jnp.allclose(out, ref, atol=1e-2, rtol=1e-2), "f32 mismatch vs reference"

    # bf16 activation streaming path (halved activation HBM traffic).
    x_bf = x.astype(jnp.bfloat16)
    out_bf = jax.block_until_ready(feed_forward(x_bf, params))
    ref_bf = _reference(x_bf.astype(jnp.float32), w1, b1, w2, b2)
    assert out_bf.dtype == jnp.bfloat16
    assert jnp.allclose(out_bf.astype(jnp.float32), ref_bf, atol=2e-2, rtol=2e-2), \
        "bf16 mismatch vs reference"

    print("KERNEL_OK")
</pallas_src>

<mosaic_0001>
module attributes {stable_mosaic.version = 11 : i64} {
  func.func @_ffn_kernel(%arg0: i32, %arg1: memref<64x128xbf16, #tpu.memory_space<vmem>>, %arg2: memref<128x128xbf16, #tpu.memory_space<vmem>>, %arg3: memref<1x128xf32, #tpu.memory_space<vmem>>, %arg4: memref<128x128xbf16, #tpu.memory_space<vmem>>, %arg5: memref<1x128xf32, #tpu.memory_space<vmem>>, %arg6: memref<64x128xf32, #tpu.memory_space<vmem>>) attributes {dimension_semantics = [#tpu.dimension_semantics<parallel>], iteration_bounds = array<i64: 2>, scalar_prefetch = 0 : i64, scratch_operands = 0 : i64, tpu.core_type = #tpu.core_type<tc>, window_params = [{transform_indices = @transform_0, window_bounds = array<i64: 64, 128>}, {pipeline_mode = #tpu.pipeline_mode<synchronous>, transform_indices = @transform_1, window_bounds = array<i64: 128, 128>}, {pipeline_mode = #tpu.pipeline_mode<synchronous>, transform_indices = @transform_2, window_bounds = array<i64: 1, 128>}, {pipeline_mode = #tpu.pipeline_mode<synchronous>, transform_indices = @transform_3, window_bounds = array<i64: 128, 128>}, {pipeline_mode = #tpu.pipeline_mode<synchronous>, transform_indices = @transform_4, window_bounds = array<i64: 1, 128>}, {transform_indices = @transform_5, window_bounds = array<i64: 64, 128>}]} {
    %c0 = arith.constant 0 : index
    %c0_0 = arith.constant 0 : index
    %0 = vector.load %arg1[%c0, %c0_0] : memref<64x128xbf16, #tpu.memory_space<vmem>>, vector<64x128xbf16>
    %c0_1 = arith.constant 0 : index
    %c0_2 = arith.constant 0 : index
    %1 = vector.load %arg2[%c0_1, %c0_2] : memref<128x128xbf16, #tpu.memory_space<vmem>>, vector<128x128xbf16>
    %cst = arith.constant dense<0.000000e+00> : vector<64x128xf32>
    %2 = tpu.matmul %0, %1, %cst {dimension_numbers = #tpu.dot_dimension_numbers<[1], [0], [0], [1], [0, 0, 1, 1], [], []>} : vector<64x128xbf16>, vector<128x128xbf16>, vector<64x128xf32> -> vector<64x128xf32>
    %c0_3 = arith.constant 0 : index
    %c0_4 = arith.constant 0 : index
    %3 = vector.load %arg3[%c0_3, %c0_4] : memref<1x128xf32, #tpu.memory_space<vmem>>, vector<1x128xf32>
    %4 = vector.broadcast %3 : vector<1x128xf32> to vector<64x128xf32>
    %5 = arith.addf %2, %4 : vector<64x128xf32>
    %6 = arith.mulf %5, %5 : vector<64x128xf32>
    %7 = arith.mulf %5, %6 : vector<64x128xf32>
    %cst_5 = arith.constant 4.471500e-02 : f32
    %8 = vector.broadcast %cst_5 : f32 to vector<64x128xf32>
    %9 = arith.mulf %8, %7 : vector<64x128xf32>
    %10 = arith.addf %5, %9 : vector<64x128xf32>
    %cst_6 = arith.constant 0.797884583 : f32
    %11 = vector.broadcast %cst_6 : f32 to vector<64x128xf32>
    %12 = arith.mulf %11, %10 : vector<64x128xf32>
    %13 = math.tanh %12 : vector<64x128xf32>
    %cst_7 = arith.constant 1.000000e+00 : f32
    %14 = vector.broadcast %cst_7 : f32 to vector<64x128xf32>
    %15 = arith.addf %14, %13 : vector<64x128xf32>
    %cst_8 = arith.constant 5.000000e-01 : f32
    %16 = vector.broadcast %cst_8 : f32 to vector<64x128xf32>
    %17 = arith.mulf %16, %15 : vector<64x128xf32>
    %18 = arith.mulf %5, %17 : vector<64x128xf32>
    %19 = arith.truncf %18 : vector<64x128xf32> to vector<64x128xbf16>
    %c0_9 = arith.constant 0 : index
    %c0_10 = arith.constant 0 : index
    %20 = vector.load %arg4[%c0_9, %c0_10] : memref<128x128xbf16, #tpu.memory_space<vmem>>, vector<128x128xbf16>
    %cst_11 = arith.constant dense<0.000000e+00> : vector<64x128xf32>
    %21 = tpu.matmul %19, %20, %cst_11 {dimension_numbers = #tpu.dot_dimension_numbers<[1], [0], [0], [1], [0, 0, 1, 1], [], []>} : vector<64x128xbf16>, vector<128x128xbf16>, vector<64x128xf32> -> vector<64x128xf32>
    %c0_12 = arith.constant 0 : index
    %c0_13 = arith.constant 0 : index
    %22 = vector.load %arg5[%c0_12, %c0_13] : memref<1x128xf32, #tpu.memory_space<vmem>>, vector<1x128xf32>
    %23 = vector.broadcast %22 : vector<1x128xf32> to vector<64x128xf32>
    %24 = arith.addf %21, %23 : vector<64x128xf32>
    %c0_14 = arith.constant 0 : index
    %c0_15 = arith.constant 0 : index
    %25 = vector.load %arg6[%c0_14, %c0_15] : memref<64x128xf32, #tpu.memory_space<vmem>>, vector<64x128xf32>
    tpu.vector_store %arg6[%c0_14, %c0_15], %24 {strides = array<i32>} : memref<64x128xf32, #tpu.memory_space<vmem>>, vector<64x128xf32>,
    return
  }
  func.func @transform_0(%arg0: i32) -> (i32, i32) {
    %c0_i32 = arith.constant 0 : i32
    %c0_i32_0 = arith.constant 0 : i32
    return %arg0, %c0_i32 : i32, i32
  }
  func.func @transform_1(%arg0: i32) -> (i32, i32) {
    %c0_i32 = arith.constant 0 : i32
    %c0_i32_0 = arith.constant 0 : i32
    %c0_i32_1 = arith.constant 0 : i32
    return %c0_i32, %c0_i32_0 : i32, i32
  }
  func.func @transform_2(%arg0: i32) -> (i32, i32) {
    %c0_i32 = arith.constant 0 : i32
    %c0_i32_0 = arith.constant 0 : i32
    %c0_i32_1 = arith.constant 0 : i32
    return %c0_i32, %c0_i32_0 : i32, i32
  }
  func.func @transform_3(%arg0: i32) -> (i32, i32) {
    %c0_i32 = arith.constant 0 : i32
    %c0_i32_0 = arith.constant 0 : i32
    %c0_i32_1 = arith.constant 0 : i32
    return %c0_i32, %c0_i32_0 : i32, i32
  }
  func.func @transform_4(%arg0: i32) -> (i32, i32) {
    %c0_i32 = arith.constant 0 : i32
    %c0_i32_0 = arith.constant 0 : i32
    %c0_i32_1 = arith.constant 0 : i32
    return %c0_i32, %c0_i32_0 : i32, i32
  }
  func.func @transform_5(%arg0: i32) -> (i32, i32) {
    %c0_i32 = arith.constant 0 : i32
    %c0_i32_0 = arith.constant 0 : i32
    return %arg0, %c0_i32 : i32, i32
  }
}

</mosaic_0001>

<bundles_post_ra>
// kernel: feed_forward.1
= control target key start
LH: loop header
LB: loop body
LE: loop exit
PB: predicated region body
PF: predicated region fallthrough
CT: control target
= control target key end

     0   :  { %s860_s18 = smov 0   ;;  %s984_s0 = inlined_call_operand.vmem [shape: bf16[128,128], index: 0, kind: input, shape index: {}]   ;;  %s985_s1 = inlined_call_operand.vmem [shape: bf16[128,128], index: 1, kind: input, shape index: {}]   ;;  %s986_s2 = inlined_call_operand.vmem [shape: f32[1,128], index: 2, kind: input, shape index: {}]   ;;  %s987_s3 = inlined_call_operand.vmem [shape: bf16[128,128], index: 3, kind: input, shape index: {}]   ;;  %s988_s4 = inlined_call_operand.vmem [shape: f32[1,128], index: 4, kind: input, shape index: {}]   ;;  %s989_s5 = inlined_call_operand.vmem [shape: f32[128,128], index: 5, kind: output, shape index: {}]  }
   0x1 LB: > { %s673_s19 = sadd.s32 4294967295, %s828_s18   ;;  %p677_p0 = scmp.ge.s32.totalorder %s828_s18, 1  ;;  %s828_s18 = sphi %s860_s18, %s15_s18  }
   0x2   : > { %p188_p1 = scmp.lt.s32.totalorder %s828_s18, 3 }
   0x4   : > { %p189_p2 = pnand %p677_p0, %p188_p1 }
   0x5   : > { %s678_s22 = sshll.u32 (!%p189_p2), %s673_s19, 3 }
   0x6   : > { %192 = sbr.rel (%p189_p2) target bundleno = 488 (0x1e8), region = 40  ;;  %p217_p3 = scmp.lt.s32.totalorder (!%p189_p2), %s678_s22, 15 }
   0xb   : > { %v786_v0 = vld [vmem:[%s985_s1 + $0x38] sm:$0xff]   ;;  %v787_v1 = vld [vmem:[%s985_s1 + $0x30] sm:$0xff]   ;;  %s991_s22 = smov (!%p217_p3, %s678_s22), 15  ;;  %v788_v2 = vld [vmem:[%s985_s1 + $0x28] sm:$0xff]  }
   0xc   : > { %730 = vmatprep.subr.bf16.mxu0 %v786_v0  ;;  %s679_s27 = sshll.u32 %s991_s22, 2  ;;  %v789_v3 = vld [vmem:[%s985_s1 + $0x20] sm:$0xff]   ;;  %v790_v5 = vld [vmem:[%s985_s1 + $0x18] sm:$0xff]   ;;  %v791_v6 = vld [vmem:[%s985_s1 + $0x10] sm:$0xff]   ;;  %s681_s11 = sshll.u32 %s991_s22, 3 }
   0xd   : > { %731 = vmatpush3.bf16.msra.mxu0 %v786_v0  ;;  %s220_s30 = scalar_lea.vmem %s984_s0, %s679_s27  ;;  %v792_v7 = vld [vmem:[%s985_s1 + $0x8] sm:$0xff]   ;;  %v793_v8 = vld [vmem:[%s985_s1] sm:$0xff]   ;;  %v798_v12 = vld [vmem:[%s987_s3 + $0x38] sm:$0xff]   ;;  %s226_s16 = scalar_lea.vmem %s989_s5, %s681_s11 }
   0xe   : > { %732 = vmatprep.subr.bf16.mxu0 %v787_v1  ;;  %v794_v4 = vld [vmem:[%s220_s30] sm:$0xff]   ;;  %v795_v9 = vld [vmem:[%s220_s30 + $0x8] sm:$0xff]   ;;  %v796_v10 = vld [vmem:[%s220_s30 + $0x10] sm:$0xff]   ;;  %754 = vmatprep.subr.bf16.mxu1 %v798_v12 }
   0xf   : > { %746 = vmatprep.mubr.bf16.mxu0 %v794_v4  ;;  %v797_v11 = vld [vmem:[%s220_s30 + $0x18] sm:$0xff]   ;;  %755 = vmatpush3.bf16.msra.mxu1 %v798_v12  ;;  %v799_v13 = vld [vmem:[%s987_s3 + $0x30] sm:$0xff]   ;;  %v800_v14 = vld [vmem:[%s987_s3 + $0x28] sm:$0xff]  }
  0x10   : > { %756 = vmatprep.subr.bf16.mxu1 %v799_v13  ;;  %v801_v15 = vld [vmem:[%s987_s3 + $0x20] sm:$0xff]   ;;  %v802_v16 = vld [vmem:[%s987_s3 + $0x18] sm:$0xff]   ;;  %v803_v17 = vld [vmem:[%s987_s3 + $0x10] sm:$0xff]  }
  0x11   : > { %733 = vmatpush3.bf16.msra.mxu0 %v787_v1  ;;  %v804_v18 = vld [vmem:[%s987_s3 + $0x8] sm:$0xff]   ;;  %v805_v19 = vld [vmem:[%s987_s3] sm:$0xff]  }
  0x12   : > { %734 = vmatprep.subr.bf16.mxu0 %v788_v2  ;;  %v682_v20 = vld [vmem:[%s986_s2] ss:$0 sm:$0xff] }
  0x13   : > { %757 = vmatpush3.bf16.msra.mxu1 %v799_v13 }
  0x14   : > { %758 = vmatprep.subr.bf16.mxu1 %v800_v14 }
  0x15   : > { %735 = vmatpush3.bf16.msra.mxu0 %v788_v2 }
  0x16   : > { %736 = vmatprep.subr.bf16.mxu0 %v789_v3 }
  0x17   : > { %759 = vmatpush3.bf16.msra.mxu1 %v800_v14 }
  0x18   : > { %760 = vmatprep.subr.bf16.mxu1 %v801_v15 }
  0x19   : > { %737 = vmatpush3.bf16.msra.mxu0 %v789_v3 }
  0x1a   : > { %738 = vmatprep.subr.bf16.mxu0 %v790_v5 }
  0x1b   : > { %761 = vmatpush3.bf16.msra.mxu1 %v801_v15 }
  0x1c   : > { %762 = vmatprep.subr.bf16.mxu1 %v802_v16 }
  0x1d   : > { %739 = vmatpush3.bf16.msra.mxu0 %v790_v5 }
  0x1e   : > { %740 = vmatprep.subr.bf16.mxu0 %v791_v6 }
  0x1f   : > { %763 = vmatpush3.bf16.msra.mxu1 %v802_v16 }
  0x20   : > { %764 = vmatprep.subr.bf16.mxu1 %v803_v17 }
  0x21   : > { %741 = vmatpush3.bf16.msra.mxu0 %v791_v6 }
  0x22   : > { %742 = vmatprep.subr.bf16.mxu0 %v792_v7 }
  0x23   : > { %765 = vmatpush3.bf16.msra.mxu1 %v803_v17 }
  0x24   : > { %766 = vmatprep.subr.bf16.mxu1 %v804_v18 }
  0x25   : > { %743 = vmatpush3.bf16.msra.mxu0 %v792_v7 }
  0x26   : > { %744 = vmatprep.subr.bf16.mxu0 %v793_v8 }
  0x27   : > { %767 = vmatpush3.bf16.msra.mxu1 %v804_v18 }
  0x28   : > { %768 = vmatprep.subr.bf16.mxu1 %v805_v19 }
  0x29   : > { %745 = vmatpush3.bf16.msra.mxu0 %v793_v8 }
  0x2b   : > { %769 = vmatpush3.bf16.msra.mxu1 %v805_v19 }
  0x2c   : > { %747 = vmatmul.mubr.bf16.vlgmr.msra.gmra.mxu0 %v795_v9 }
  0x2d   : > { %750 = vmatprep.mubr.bf16.mxu0 %v796_v10 }
  0x34   : > { %751 = vmatmul.mubr.bf16.gmra.mxu0 %v797_v11 }
  0xec   : > { %v748_v21 = vpop.f32.mrf.mxu0 }
  0xed   : > { %v925_v22 = vadd.f32 %v748_v21, %v682_v20 }
  0xee   : > { %v366_v23 = vpop.f32.mrf.mxu0 }
  0xef   : > { %v399_v24 = vmul.f32 %v925_v22, %v925_v22  ;;  %v929_v25 = vadd.f32 %v682_v20, %v366_v23 }
  0xf0   : > { %v749_v26 = vpop.f32.mrf.mxu0 }
  0xf1   : > { %v407_v27 = vmul.f32 %v399_v24, %v925_v22  ;;  %v397_v28 = vmul.f32 %v929_v25, %v929_v25  ;;  %v934_v29 = vadd.f32 %v749_v26, %v682_v20 }
  0xf2   : > { %v369_v30 = vpop.f32.mrf.mxu0 }
  0xf3   : > { %v415_v31 = vmul.f32 0.044715, %v407_v27  ;;  %v405_v32 = vmul.f32 %v397_v28, %v929_v25  ;;  %v400_v33 = vmul.f32 %v934_v29, %v934_v29  ;;  %v939_v34 = vadd.f32 %v682_v20, %v369_v30 }
  0xf4   : > { %v752_v35 = vpop.f32.mrf.mxu0 }
  0xf5   : > { %v423_v36 = vadd.f32 %v415_v31, %v925_v22  ;;  %v413_v37 = vmul.f32 0.044715, %v405_v32  ;;  %v408_v38 = vmul.f32 %v400_v33, %v934_v29  ;;  %v398_v39 = vmul.f32 %v939_v34, %v939_v34 }
  0xf6   : > { %v945_v40 = vadd.f32 %v752_v35, %v682_v20  ;;  %v382_v41 = vpop.f32.mrf.mxu0 }
  0xf7   : > { %v431_v42 = vmul.f32 0.7978846, %v423_v36  ;;  %v421_v43 = vadd.f32 %v413_v37, %v929_v25  ;;  %v416_v44 = vmul.f32 0.044715, %v408_v38  ;;  %v406_v45 = vmul.f32 %v398_v39, %v939_v34 }
  0xf8   : > { %v403_v46 = vmul.f32 %v945_v40, %v945_v40  ;;  %v951_v47 = vadd.f32 %v682_v20, %v382_v41  ;;  %v753_v48 = vpop.f32.mrf.mxu0 }
  0xf9   : > { %v424_v49 = vadd.f32 %v416_v44, %v934_v29  ;;  %v414_v50 = vmul.f32 0.044715, %v406_v45  ;;  %v954_v51 = vadd.f32 %v753_v48, %v682_v20  ;;  %806 = vtanh.f32 %v431_v42 }
  0xfa   : > { %v411_v52 = vmul.f32 %v403_v46, %v945_v40  ;;  %v401_v53 = vmul.f32 %v951_v47, %v951_v47  ;;  %v385_v54 = vpop.f32.mrf.mxu0  ;;  %v429_v55 = vmul.f32 0.7978846, %v421_v43 }
  0xfb   : > { %v432_v56 = vmul.f32 0.7978846, %v424_v49  ;;  %v422_v57 = vadd.f32 %v414_v50, %v939_v34  ;;  %v404_v58 = vmul.f32 %v954_v51, %v954_v51  ;;  %v386_v59 = vadd.f32 %v682_v20, %v385_v54 }
  0xfc   : > { %v419_v60 = vmul.f32 0.044715, %v411_v52  ;;  %v409_v61 = vmul.f32 %v401_v53, %v951_v47  ;;  %808 = vtanh.f32 %v429_v55  ;;  %v695_v52 = vld [vmem:[%s988_s4] ss:$0 sm:$0xff] }
  0xfd   : > { %810 = vtanh.f32 %v432_v56  ;;  %v412_v62 = vmul.f32 %v404_v58, %v954_v51  ;;  %v402_v63 = vmul.f32 %v386_v59, %v386_v59  ;;  %v430_v0 = vmul.f32 0.7978846, %v422_v57 }
  0xfe   : > { %v427_v1 = vadd.f32 %v419_v60, %v945_v40  ;;  %v417_v2 = vmul.f32 0.044715, %v409_v61 }
  0xff   : > { %v420_v3 = vmul.f32 0.044715, %v412_v62  ;;  %v410_v4 = vmul.f32 %v402_v63, %v386_v59  ;;  %812 = vtanh.f32 %v430_v0 }
 0x100   : > { %v435_v5 = vmul.f32 0.7978846, %v427_v1  ;;  %v425_v6 = vadd.f32 %v417_v2, %v951_v47 }
 0x101   : > { %v428_v7 = vadd.f32 %v420_v3, %v954_v51  ;;  %v418_v8 = vmul.f32 0.044715, %v410_v4 }
 0x102   : > { %814 = vtanh.f32 %v435_v5  ;;  %v433_v9 = vmul.f32 0.7978846, %v425_v6 }
 0x103   : > { %v436_v10 = vmul.f32 0.7978846, %v428_v7  ;;  %v426_v11 = vadd.f32 %v418_v8, %v386_v59 }
 0x104   : > { %816 = vtanh.f32 %v433_v9 }
 0x105   : > { %818 = vtanh.f32 %v436_v10  ;;  %v434_v12 = vmul.f32 0.7978846, %v426_v11 }
 0x106   : > { %v807_v13 = vpop.eup %806 }
 0x107   : > { %820 = vtanh.f32 %v434_v12  ;;  %v447_v17 = vadd.f32 1.0, %v807_v13 }
 0x109   : > { %v809_v14 = vpop.eup %808  ;;  %v455_v24 = vmul.f32 0.5, %v447_v17 }
 0x10a   : > { %v811_v15 = vpop.eup %810  ;;  %v445_v16 = vadd.f32 1.0, %v809_v14 }
 0x10b   : > { %v448_v18 = vadd.f32 1.0, %v811_v15  ;;  %v463_v35 = vmul.f32 %v455_v24, %v925_v22 }
 0x10c   : > { %v813_v19 = vpop.eup %812  ;;  %v453_v21 = vmul.f32 0.5, %v445_v16 }
 0x10d   : > { %v446_v20 = vadd.f32 1.0, %v813_v19  ;;  %v456_v23 = vmul.f32 0.5, %v448_v18 }
 0x10e   : > { %v461_v31 = vmul.f32 %v453_v21, %v929_v25 }
 0x10f   : > { %v815_v26 = vpop.eup %814  ;;  %v454_v27 = vmul.f32 0.5, %v446_v20  ;;  %v464_v28 = vmul.f32 %v456_v23, %v934_v29 }
 0x110   : > { %v451_v37 = vadd.f32 1.0, %v815_v26 }
 0x111   : > { %v817_v30 = vpop.eup %816  ;;  %v462_v32 = vmul.f32 %v454_v27, %v939_v34  ;;  %v470_v42 = vpack.c.bf16 %v464_v28, %v463_v35 }
 0x112   : > { %v819_v33 = vpop.eup %818  ;;  %v449_v36 = vadd.f32 1.0, %v817_v30  ;;  %v459_v29 = vmul.f32 0.5, %v451_v37 }
 0x113   : > { %v469_v38 = vpack.c.bf16 %v462_v32, %v461_v31  ;;  %v452_v39 = vadd.f32 1.0, %v819_v33 }
 0x114   : > { %v821_v41 = vpop.eup %820  ;;  %v457_v44 = vmul.f32 0.5, %v449_v36  ;;  %v467_v22 = vmul.f32 %v459_v29, %v945_v40 }
 0x115   : > { %770 = vmatprep.mubr.bf16.mxu1 %v469_v38  ;;  %v450_v43 = vadd.f32 1.0, %v821_v41  ;;  %v460_v45 = vmul.f32 0.5, %v452_v39 }
 0x116   : > { %771 = vmatmul.mubr.bf16.vlgmr.msra.gmra.mxu1 %v470_v42  ;;  %v465_v34 = vmul.f32 %v457_v44, %v951_v47 }
 0x117   : > { %v458_v46 = vmul.f32 0.5, %v450_v43  ;;  %v468_v25 = vmul.f32 %v460_v45, %v954_v51 }
 0x119   : > { %v466_v48 = vmul.f32 %v458_v46, %v386_v59  ;;  %v472_v50 = vpack.c.bf16 %v468_v25, %v467_v22 }
 0x11b   : > { %v471_v49 = vpack.c.bf16 %v466_v48, %v465_v34 }
 0x11d   : > { %774 = vmatprep.mubr.bf16.mxu1 %v471_v49 }
 0x11e   : > { %775 = vmatmul.mubr.bf16.gmra.mxu1 %v472_v50 }
 0x1d6   : > { %v772_v53 = vpop.f32.mrf.mxu1 }
 0x1d7   : > { %v587_v51 = vadd.f32 %v772_v53, %v695_v52 }
 0x1d8   : > { %v578_v54 = vpop.f32.mrf.mxu1 }
 0x1d9   : > { %611 = vst [vmem:[%s226_s16 + $0x10] sm:$0xff] %v587_v51  ;;  %v579_v47 = vadd.f32 %v695_v52, %v578_v54 }
 0x1da   : > { %v773_v55 = vpop.f32.mrf.mxu1 }
 0x1db   : > { %609 = vst [vmem:[%s226_s16] sm:$0xff] %v579_v47  ;;  %v590_v40 = vadd.f32 %v773_v55, %v695_v52 }
 0x1dc   : > { %v581_v56 = vpop.f32.mrf.mxu1 }
 0x1dd   : > { %612 = vst [vmem:[%s226_s16 + $0x18] sm:$0xff] %v590_v40  ;;  %v582_v57 = vadd.f32 %v695_v52, %v581_v56 }
 0x1de   : > { %v776_v58 = vpop.f32.mrf.mxu1 }
 0x1df   : > { %610 = vst [vmem:[%s226_s16 + $0x8] sm:$0xff] %v582_v57  ;;  %v603_v59 = vadd.f32 %v776_v58, %v695_v52 }
 0x1e0   : > { %v594_v60 = vpop.f32.mrf.mxu1 }
 0x1e1   : > { %615 = vst [vmem:[%s226_s16 + $0x30] sm:$0xff] %v603_v59  ;;  %v595_v61 = vadd.f32 %v695_v52, %v594_v60 }
 0x1e2   : > { %v777_v62 = vpop.f32.mrf.mxu1 }
 0x1e3   : > { %613 = vst [vmem:[%s226_s16 + $0x20] sm:$0xff] %v595_v61  ;;  %v606_v63 = vadd.f32 %v777_v62, %v695_v52 }
 0x1e4   : > { %v597_v0 = vpop.f32.mrf.mxu1 }
 0x1e5   : > { %616 = vst [vmem:[%s226_s16 + $0x38] sm:$0xff] %v606_v63  ;;  %v598_v1 = vadd.f32 %v695_v52, %v597_v0 }
 0x1e7   : > { %614 = vst [vmem:[%s226_s16 + $0x28] sm:$0xff] %v598_v1 }
 0x1e8 PF: > { %s15_s18 = sadd.s32 1, %s828_s18  }
 0x1e9   : > { %p12_p4 = scmp.ge.s32.totalorder %s15_s18, 4  }
 0x1eb   :  { %14 = sbr.rel (!%p12_p4) target bundleno = 1 (0x1), region = 70 }

</bundles_post_ra>
